<compile_context>
chip_gen: v5e
topology: v5e:2x2
jax: 0.10.0
libtpu: 0.0.40
codegen_flags: <defaults>
</compile_context>

<pallas_src>
import jax
import jax.numpy as jnp
from jax.experimental import pallas as pl
from jax.experimental.pallas import tpu as pltpu

STATE_DIM = 4
HIDDEN = 64
PACK_COLS = 8          # cols 0:4 = fc1.weight, 4 = fc1.bias, 5 = fc2.weight, 6:8 unused
MAX_BLOCK_B = 2048     # sweep point; 1024-4096 all fit VMEM comfortably on v5e/v6e/v7x


def _choose_block_b(batch):
    """Largest lane-multiple batch tile that still leaves >= ~4 grid blocks."""
    bp = pl.cdiv(batch, 128) * 128
    if bp <= 2 * 128:
        return 128
    blk = (bp // 4) // 128 * 128           # aim for >= 4 'parallel' blocks (v7x dual-TC)
    return int(min(MAX_BLOCK_B, max(128, blk)))


def valuenet_kernel(xT_ref, w_ref, b2_ref, o_ref):
    # xT_ref : (STATE_DIM, BLOCK_B) VMEM  -- batch on the lane axis
    # w_ref  : (HIDDEN, PACK_COLS)  VMEM  -- packed fc1.weight / fc1.bias / fc2.weight
    # b2_ref : (1, 1)               SMEM  -- fc2 bias scalar
    # o_ref  : (1, BLOCK_B)         VMEM  -- lane-dense output
    w = w_ref[...]                                   # (64, 8) resident constant tile
    w1 = w[:, 0:STATE_DIM]                           # (64, 4)  fc1.weight
    b1 = w[:, STATE_DIM:STATE_DIM + 1]               # (64, 1)  fc1.bias
    w2 = w[:, STATE_DIM + 1:STATE_DIM + 2]           # (64, 1)  fc2.weight (as a column)

    # Layer 1 on the MXU with f32 accumulation: (64,4) @ (4,BLOCK_B) -> (64,BLOCK_B)
    h = jnp.dot(w1, xT_ref[...], preferred_element_type=jnp.float32)
    h = jnp.maximum(h + b1, 0.0)

    # Layer 2 (N=1): VPU multiply + sublane reduce -> (1, BLOCK_B); scalar bias from SMEM.
    o = jnp.sum(h * w2, axis=0, keepdims=True) + b2_ref[0, 0]
    o_ref[...] = o.astype(o_ref.dtype)


def value_net_forward(x, w_packed, b2_s):
    """x: (B, STATE_DIM) f32; packed params from pack_params; returns (B, 1) f32."""
    B = x.shape[0]
    block_b = _choose_block_b(B)
    nb = pl.cdiv(B, block_b)
    Bp = nb * block_b

    # Layout plumbing: put the batch on the lane axis; zero-pad to the tile size.
    xT = x.T
    if Bp != B:
        xT = jnp.pad(xT, ((0, 0), (0, Bp - B)))

    out = pl.pallas_call(
        valuenet_kernel,
        out_shape=jax.ShapeDtypeStruct((1, Bp), jnp.float32),
        grid=(nb,),
        in_specs=[
            pl.BlockSpec((STATE_DIM, block_b), lambda i: (0, i)),
            pl.BlockSpec((HIDDEN, PACK_COLS), lambda i: (0, 0)),
            pl.BlockSpec((1, 1), lambda i: (0, 0),
                         memory_space=pltpu.MemorySpace.SMEM),
        ],
        out_specs=pl.BlockSpec((1, block_b), lambda i: (0, i)),
        compiler_params=pltpu.CompilerParams(
            dimension_semantics=("parallel",),
            vmem_limit_bytes=32 * 1024 * 1024,
        ),
    )(xT, w_packed, b2_s)

    # (1, Bp) lane-dense slab -> (B, 1); padded columns are sliced off.
    return out[0, :B].reshape(B, 1)


def init_params(key, state_dim=STATE_DIM, hidden=HIDDEN):
    """PyTorch-layout params with PyTorch Linear default init U(-1/sqrt(fan_in), ...)."""
    k1, k2, k3, k4 = jax.random.split(key, 4)
    bound1 = 1.0 / jnp.sqrt(state_dim)
    bound2 = 1.0 / jnp.sqrt(hidden)
    w1 = jax.random.uniform(k1, (hidden, state_dim), jnp.float32, -bound1, bound1)  # fc1.weight
    b1 = jax.random.uniform(k2, (hidden,), jnp.float32, -bound1, bound1)            # fc1.bias
    w2 = jax.random.uniform(k3, (1, hidden), jnp.float32, -bound2, bound2)          # fc2.weight
    b2 = jax.random.uniform(k4, (1,), jnp.float32, -bound2, bound2)                 # fc2.bias
    return w1, b1, w2, b2


def pack_params(w1, b1, w2, b2):
    """One-time layout plumbing: fold fc1.weight / fc1.bias / fc2.weight into one operand."""
    w_packed = jnp.zeros((HIDDEN, PACK_COLS), jnp.float32)
    w_packed = w_packed.at[:, :STATE_DIM].set(w1)            # fc1.weight  (64, 4)
    w_packed = w_packed.at[:, STATE_DIM].set(b1)             # fc1.bias    (64,)
    w_packed = w_packed.at[:, STATE_DIM + 1].set(w2[0])      # fc2.weight  (64,)
    b2_s = b2.reshape(1, 1).astype(jnp.float32)               # fc2.bias scalar -> SMEM
    return w_packed, b2_s


if __name__ == "__main__":
    key = jax.random.PRNGKey(0)
    kx, kp = jax.random.split(key)

    w1, b1, w2, b2 = init_params(kp)
    packed = pack_params(w1, b1, w2, b2)

    def ref_forward(x):
        # Same math as the PyTorch module: relu(x @ W1^T + b1) @ W2^T + b2.
        return jnp.maximum(x @ w1.T + b1, 0.0) @ w2.T + b2

    # Batch large enough to exercise >= 2 grid blocks on the "parallel" axis.
    x_a = jax.random.normal(kx, (256, STATE_DIM), jnp.float32)
    out_a = jax.block_until_ready(value_net_forward(x_a, *packed))
    assert out_a.shape == (256, 1)
    assert jnp.allclose(out_a, ref_forward(x_a), atol=1e-4, rtol=1e-5)

    # Ragged batch exercising the zero-pad / slice-off path.
    x_b = jax.random.normal(kx, (37, STATE_DIM), jnp.float32)
    out_b = jax.block_until_ready(value_net_forward(x_b, *packed))
    assert out_b.shape == (37, 1)
    assert jnp.allclose(out_b, ref_forward(x_b), atol=1e-4, rtol=1e-5)

    print("KERNEL_OK")
</pallas_src>

<mosaic_0001>
module attributes {stable_mosaic.version = 11 : i64} {
  func.func @valuenet_kernel(%arg0: i32, %arg1: memref<4x128xf32, #tpu.memory_space<vmem>>, %arg2: memref<64x8xf32, #tpu.memory_space<vmem>>, %arg3: memref<1x1xf32, #tpu.memory_space<smem>>, %arg4: memref<1x128xf32, #tpu.memory_space<vmem>>) attributes {dimension_semantics = [#tpu.dimension_semantics<parallel>], iteration_bounds = array<i64: 2>, scalar_prefetch = 0 : i64, scratch_operands = 0 : i64, tpu.core_type = #tpu.core_type<tc>, window_params = [{transform_indices = @transform_0, window_bounds = array<i64: 4, 128>}, {pipeline_mode = #tpu.pipeline_mode<synchronous>, transform_indices = @transform_1, window_bounds = array<i64: 64, 8>}, {transform_indices = @transform_2, window_bounds = array<i64: 1, 1>}, {transform_indices = @transform_3, window_bounds = array<i64: 1, 128>}]} {
    %c0 = arith.constant 0 : index
    %c0_0 = arith.constant 0 : index
    %0 = vector.load %arg2[%c0, %c0_0] : memref<64x8xf32, #tpu.memory_space<vmem>>, vector<64x8xf32>
    %1 = vector.extract_strided_slice %0 {offsets = [0, 0], sizes = [64, 4], strides = [1, 1]} : vector<64x8xf32> to vector<64x4xf32>
    %2 = vector.extract_strided_slice %0 {offsets = [0, 4], sizes = [64, 1], strides = [1, 1]} : vector<64x8xf32> to vector<64x1xf32>
    %3 = vector.extract_strided_slice %0 {offsets = [0, 5], sizes = [64, 1], strides = [1, 1]} : vector<64x8xf32> to vector<64x1xf32>
    %c0_1 = arith.constant 0 : index
    %c0_2 = arith.constant 0 : index
    %4 = vector.load %arg1[%c0_1, %c0_2] : memref<4x128xf32, #tpu.memory_space<vmem>>, vector<4x128xf32>
    %cst = arith.constant dense<0.000000e+00> : vector<64x128xf32>
    %5 = tpu.matmul %1, %4, %cst {dimension_numbers = #tpu.dot_dimension_numbers<[1], [0], [0], [1], [0, 0, 1, 1], [], []>} : vector<64x4xf32>, vector<4x128xf32>, vector<64x128xf32> -> vector<64x128xf32>
    %6 = vector.broadcast %2 : vector<64x1xf32> to vector<64x128xf32>
    %7 = arith.addf %5, %6 : vector<64x128xf32>
    %cst_3 = arith.constant 0.000000e+00 : f32
    %8 = vector.broadcast %cst_3 : f32 to vector<64x128xf32>
    %9 = arith.maximumf %7, %8 : vector<64x128xf32>
    %10 = vector.broadcast %3 : vector<64x1xf32> to vector<64x128xf32>
    %11 = arith.mulf %9, %10 : vector<64x128xf32>
    %cst_4 = arith.constant dense<0.000000e+00> : vector<128xf32>
    %12 = vector.multi_reduction <add>, %11, %cst_4 [0] : vector<64x128xf32> to vector<128xf32>
    %13 = vector.shape_cast %12 : vector<128xf32> to vector<1x128xf32>
    %c0_5 = arith.constant 0 : index
    %c0_6 = arith.constant 0 : index
    %14 = memref.load %arg3[%c0_5, %c0_6] : memref<1x1xf32, #tpu.memory_space<smem>>
    %15 = vector.broadcast %14 : f32 to vector<1x128xf32>
    %16 = arith.addf %13, %15 : vector<1x128xf32>
    %c0_7 = arith.constant 0 : index
    %c0_8 = arith.constant 0 : index
    %17 = vector.load %arg4[%c0_7, %c0_8] : memref<1x128xf32, #tpu.memory_space<vmem>>, vector<1x128xf32>
    tpu.vector_store %arg4[%c0_7, %c0_8], %16 {strides = array<i32>} : memref<1x128xf32, #tpu.memory_space<vmem>>, vector<1x128xf32>,
    return
  }
  func.func @transform_0(%arg0: i32) -> (i32, i32) {
    %c0_i32 = arith.constant 0 : i32
    %c0_i32_0 = arith.constant 0 : i32
    return %c0_i32, %arg0 : i32, i32
  }
  func.func @transform_1(%arg0: i32) -> (i32, i32) {
    %c0_i32 = arith.constant 0 : i32
    %c0_i32_0 = arith.constant 0 : i32
    %c0_i32_1 = arith.constant 0 : i32
    return %c0_i32, %c0_i32_0 : i32, i32
  }
  func.func @transform_2(%arg0: i32) -> (i32, i32) {
    %c0_i32 = arith.constant 0 : i32
    %c0_i32_0 = arith.constant 0 : i32
    %c0_i32_1 = arith.constant 0 : i32
    return %c0_i32, %c0_i32_0 : i32, i32
  }
  func.func @transform_3(%arg0: i32) -> (i32, i32) {
    %c0_i32 = arith.constant 0 : i32
    %c0_i32_0 = arith.constant 0 : i32
    return %c0_i32, %arg0 : i32, i32
  }
}

</mosaic_0001>

<bundles_post_ra>
// kernel: tpu_custom_call.1
= control target key start
LH: loop header
LB: loop body
LE: loop exit
PB: predicated region body
PF: predicated region fallthrough
CT: control target
= control target key end

     0   :  { %s686_s0 = inlined_call_operand.vmem [shape: f32[4,256], index: 0, kind: input, shape index: {}]   ;;  %s687_s1 = inlined_call_operand.vmem [shape: f32[64,8], index: 1, kind: input, shape index: {}]   ;;  %s688_s2 = inlined_call_operand.<no memory space> [shape: f32[1,1], index: 2, kind: input, shape index: {}]   ;;  %s689_s3 = inlined_call_operand.hbm [shape: f32[1,256], index: 3, kind: output, shape index: {}]  }
   0x1   :  { %8 = sst [smem:[#allocation2]] %s688_s2 }
   0x2   :  { %9 = vsyncpa [#allocation4], 0 }
   0x3   :  { %11 = vsyncpa [#allocation4 + $0x1], 0  ;;  %s569_s14 = smov 0   ;;  %s571_s15 = smov 0  }
   0x4   :  { %s573_s16 = smov 0   ;;  %s575_s17 = smov 0  }
   0x5 LB: > { %s590_s2 = sadd.s32 4294967295, %s542_s17   ;;  %s410_s18 = sadd.s32 4294967294, %s542_s17   ;;  %s542_s17 = sphi %s575_s17, %s695_s17   ;;  %s538_s16 = sphi %s573_s16, %s694_s16   ;;  %s534_s15 = sphi %s571_s15, %s693_s15   ;;  %s530_s14 = sphi %s569_s14, %s692_s14  }
   0x6   : > { %s594_s19 = sadd.s32 1, %s542_s17   ;;  %s92_s20 = sadd.s32 1, %s538_s16 }
   0x7   : > { %s89_s21 = ssub.s32 %s542_s17, %s594_s19  ;;  %p102_p0 = scmp.ne.s32.totalorder %s538_s16, %s534_s15 }
   0x8   : > { %p90_p1 = scmp.eq.s32.totalorder %s89_s21, 0  ;;  %p103_p2 = scmp.eq.s32.totalorder %s590_s2, 1 }
   0x9   : > { %p108_p3 = scmp.ne.s32.totalorder %s534_s15, %s530_s14  ;;  %p109_p4 = scmp.eq.s32.totalorder %s410_s18, 1 }
   0xa   : > { %s605_s22 = scalar_select %p90_p1, %s538_s16, %s92_s20  }
   0xb   : > { %p607_p5 = por %p103_p2, %p102_p0  ;;  %p611_p6 = por %p109_p4, %p108_p3 }
   0xc   : > { %p413_p7 = scmp.ge.s32.totalorder %s542_s17, 1  ;;  %p140_p8 = scmp.lt.s32.totalorder %s542_s17, 3 }
   0xe   : > { %p141_p9 = pnand %p413_p7, %p140_p8 }
   0xf   : > { %p162_p10 = scmp.lt.s32.totalorder (!%p141_p9), %s590_s2, 1  ;;  %s338_s27 = sld [smem:[#allocation2]] (!%p141_p9) }
  0x10   : > { %144 = sbr.rel (%p141_p9) target bundleno = 202 (0xca), region = 32  ;;  %s160_s28 = sand.u32 (!%p141_p9), 1, %s534_s15  }
  0x11   : > { %s351_s4 = scalar_lea.hbm (!%p141_p9), %s689_s3, %s590_s2  ;;  %s500_s12 = scalar_lea.hbm (!%p141_p9), %s689_s3, 2 }
  0x12   : > { %s355_s7 = sshll.u32 (!%p141_p9), %s351_s4, 4  ;;  %s356_s7 = int_to_ptr.hbm [resolvable:$true] %s355_s7 }
  0x13   : > { %s494_s9 = sshra.s32 (!%p141_p9), %s356_s7, 4  ;;  %s495_s9 = int_to_ptr.hbm [resolvable:$true] %s494_s9 }
  0x14   : > { %s496_s10 = scalar_lea.hbm (!%p141_p9), %s495_s9, 1  ;;  %p501_p0 = scmp.lt.s32.totalorder (!%p141_p9), %s495_s9, %s689_s3 }
  0x15   : > { %v168_v0 = vld [vmem:[%s687_s1 + $0x10] sm:$0xff]  ;;  %v166_v1 = vld [vmem:[%s687_s1] sm:$0xff]  ;;  %v544_v2 = vmov 4   ;;  %s163_s29 = scalar_select %p162_p10, %s590_s2, 1  ;;  %vm232_vm0 = vcmask 1043456   ;;  %vm215_vm1 = vcmask 31744  }
  0x16   : > { %471 = vset.pattern.permute.xlu1 %v544_v2  ;;  %470 = vset.pattern.permute.xlu0 %v544_v2  ;;  %v170_v3 = vld [vmem:[%s687_s1 + $0x20] sm:$0xff]  ;;  %v172_v5 = vld [vmem:[%s687_s1 + $0x30] sm:$0xff]  ;;  %v169_v6 = vld [vmem:[%s687_s1 + $0x18] sm:$0xff]  ;;  %v545_v8 = vmov 5   ;;  %p497_p11 = scmp.ne.s32.totalorder %s495_s9, %s496_s10  ;;  %p502_p1 = scmp.lt.s32.totalorder %s500_s12, %s496_s10 }
  0x17   : > { %187 = vperm.xlu1 %471, %v168_v0   ;;  %177 = vperm.xlu0 %470, %v166_v1   ;;  %s414_s5 = sshll.u32 %s163_s29, 2  ;;  %v167_v7 = vld [vmem:[%s687_s1 + $0x8] sm:$0xff]  ;;  %v173_v10 = vld [vmem:[%s687_s1 + $0x38] sm:$0xff] }
  0x18   : > { %472 = vset.pattern.permute.xlu2 %v544_v2  ;;  %s165_s8 = scalar_lea.vmem %s686_s0, %s414_s5  ;;  %v171_v9 = vld [vmem:[%s687_s1 + $0x28] sm:$0xff]  ;;  %s161_s5 = scalar_lea.vmem [#allocation3], %s160_s28 }
  0x19   : > { %197 = vperm.xlu2 %472, %v170_v3   ;;  %v174_v4 = vld [vmem:[%s165_s8] sm:$0xf]  ;;  %s353_s6 = sshll.u32 %s161_s5, 4  ;;  %s343_s8 = scalar_lea.sflag [#allocation4], %s160_s28  ;;  %s354_s6 = int_to_ptr.vmem [resolvable:$true] %s353_s6 }
  0x1a   : > { %415 = vmatpush.msk.msra.mxu0 %vm232_vm0, %v174_v4  ;;  %426 = vmatpush.msk.msra.mxu1 %vm232_vm0, %v174_v4  ;;  %p498_p12 = pnand %p497_p11, %p607_p5  ;;  %p503_p2 = por %p502_p1, %p501_p0 }
  0x1b   : > { %427 = vmatpush.msk.msra.mxu2 %vm232_vm0, %v174_v4  ;;  %428 = vmatpush.msk.msra.mxu3 %vm232_vm0, %v174_v4 }
  0x1c   : > { %416 = vmatmul.msk.f32.vlgmr.msra.gmra.mxu0 %vm215_vm1, %v166_v1  ;;  %418 = vmatmul.msk.f32.vlgmr.msra.gmra.mxu1 %vm215_vm1, %v168_v0  ;;  %p499_p13 = pneg %p498_p12 }
  0x1d   : > { %420 = vmatmul.msk.f32.vlgmr.msra.gmra.mxu2 %vm215_vm1, %v170_v3  ;;  %422 = vmatmul.msk.f32.vlgmr.msra.gmra.mxu3 %vm215_vm1, %v172_v5 }
  0x1e   : > { %p504_p3 = pnand %p503_p2, %p499_p13 }
  0x1f   : > { %192 = vperm.xlu1 %471, %v169_v6   ;;  %182 = vperm.xlu0 %470, %v167_v7  }
  0x21   : > { %473 = vset.pattern.permute.xlu2 %v545_v8 }
  0x22   : > { %286 = vperm.xlu2 %473, %v166_v1  }
  0x24   : > { %417 = vmatmul.msk.f32.gmra.mxu0 %vm215_vm1, %v167_v7  ;;  %419 = vmatmul.msk.f32.gmra.mxu1 %vm215_vm1, %v169_v6 }
  0x25   : > { %421 = vmatmul.msk.f32.gmra.mxu2 %vm215_vm1, %v171_v9  ;;  %423 = vmatmul.msk.f32.gmra.mxu3 %vm215_vm1, %v173_v10 }
  0x27   : > { %475 = vset.pattern.permute.xlu1 %v545_v8  ;;  %474 = vset.pattern.permute.xlu0 %v545_v8 }
  0x28   : > { %294 = vperm.xlu1 %475, %v168_v0   ;;  %290 = vperm.xlu0 %474, %v167_v7   ;;  %v339_v7 = vstv %s338_s27 }
  0x2a   : > { %476 = vset.pattern.permute.xlu2 %v544_v2 }
  0x2b   : > { %202 = vperm.xlu2 %476, %v171_v9  }
  0x30   : > { %298 = vperm.xlu1 %475, %v169_v6   ;;  %302 = vperm.xlu0 %474, %v170_v3  }
  0x33   : > { %207 = vperm.xlu2 %476, %v172_v5  }
  0x38   : > { %477 = vset.pattern.permute.xlu1 %v544_v2  ;;  %310 = vperm.xlu0 %474, %v172_v5  }
  0x39   : > { %212 = vperm.xlu1 %477, %v173_v10  }
  0x3b   : > { %478 = vset.pattern.permute.xlu2 %v545_v8 }
  0x3c   : > { %306 = vperm.xlu2 %478, %v171_v9  }
  0x41   : > { %479 = vset.pattern.permute.xlu1 %v545_v8 }
  0x42   : > { %314 = vperm.xlu1 %479, %v173_v10  }
  0x73   : > { %v198_v11 = vpop.permute.xlu2 %197 }
  0x7c   : > { %v287_v14 = vpop.permute.xlu2 %286 }
  0x85   : > { %v203_v17 = vpop.permute.xlu2 %202 }
  0x89   : > { %v188_v12 = vpop.permute.xlu1 %187  ;;  %v178_v13 = vpop.permute.xlu0 %177 }
  0x8d   : > { %v208_v32 = vpop.permute.xlu2 %207 }
  0x91   : > { %v193_v15 = vpop.permute.xlu1 %192  ;;  %v183_v16 = vpop.permute.xlu0 %182 }
  0x96   : > { %v307_v51 = vpop.permute.xlu2 %306 }
  0x99   : > { %v253_v19 = vpop.f32.mrf.mxu0  ;;  %v259_v20 = vpop.f32.mrf.mxu1 }
  0x9a   : > { %v295_v18 = vpop.permute.xlu1 %294  ;;  %v291_v21 = vpop.permute.xlu0 %290  ;;  %v254_v22 = vadd.f32 %v253_v19, %v178_v13  ;;  %v260_v24 = vadd.f32 %v259_v20, %v188_v12 }
  0x9c   : > { %v277_v28 = vmax.f32 %v254_v22, 0.0  ;;  %v279_v33 = vmax.f32 %v260_v24, 0.0 }
  0x9e   : > { %v317_v37 = vmul.f32 %v287_v14, %v277_v28  ;;  %v319_v41 = vmul.f32 %v295_v18, %v279_v33 }
  0xa0   : > { %v265_v23 = vpop.f32.mrf.mxu2  ;;  %v271_v29 = vpop.f32.mrf.mxu3 }
  0xa1   : > { %v256_v26 = vpop.f32.mrf.mxu0  ;;  %v262_v27 = vpop.f32.mrf.mxu1  ;;  %v266_v34 = vadd.f32 %v265_v23, %v198_v11  ;;  %v272_v50 = vadd.f32 %v271_v29, %v208_v32 }
  0xa2   : > { %v299_v25 = vpop.permute.xlu1 %298  ;;  %v257_v30 = vadd.f32 %v256_v26, %v183_v16  ;;  %v263_v31 = vadd.f32 %v262_v27, %v193_v15  ;;  %v303_v35 = vpop.permute.xlu0 %302 }
  0xa3   : > { %v281_v42 = vmax.f32 %v266_v34, 0.0  ;;  %v283_v58 = vmax.f32 %v272_v50, 0.0 }
  0xa4   : > { %v278_v36 = vmax.f32 %v257_v30, 0.0  ;;  %v280_v39 = vmax.f32 %v263_v31, 0.0 }
  0xa5   : > { %v321_v52 = vmul.f32 %v303_v35, %v281_v42 }
  0xa6   : > { %v318_v38 = vmul.f32 %v291_v21, %v278_v36  ;;  %v320_v46 = vmul.f32 %v299_v25, %v280_v39 }
  0xa8   : > { %v268_v40 = vpop.f32.mrf.mxu2  ;;  %v325_v43 = vadd.f32 %v318_v38, %v317_v37  ;;  %v274_v49 = vpop.f32.mrf.mxu3 }
  0xa9   : > { %v269_v44 = vadd.f32 %v268_v40, %v203_v17 }
  0xaa   : > { %v326_v47 = vadd.f32 %v325_v43, %v319_v41  ;;  %v311_v55 = vpop.permute.xlu0 %310 }
  0xab   : > { %v213_v45 = vpop.permute.xlu1 %212  ;;  %v282_v48 = vmax.f32 %v269_v44, 0.0  ;;  %v323_v60 = vmul.f32 %v311_v55, %v283_v58 }
  0xac   : > { %v327_v53 = vadd.f32 %v326_v47, %v320_v46  ;;  %v275_v54 = vadd.f32 %v274_v49, %v213_v45 }
  0xad   : > { %v322_v56 = vmul.f32 %v307_v51, %v282_v48 }
  0xae   : > { %v328_v57 = vadd.f32 %v327_v53, %v321_v52  ;;  %v284_v61 = vmax.f32 %v275_v54, 0.0 }
  0xb0   : > { %v329_v59 = vadd.f32 %v328_v57, %v322_v56 }
  0xb2   : > { %v330_v0 = vadd.f32 %v329_v59, %v323_v60 }
  0xb4   : > { %v315_v62 = vpop.permute.xlu1 %314 }
  0xb5   : > { %v324_v63 = vmul.f32 %v315_v62, %v284_v61 }
  0xb7   : > { %v331_v1 = vadd.f32 %v330_v0, %v324_v63 }
  0xb9   : > { %v332_v2 = vrot.slane %v331_v1, 4 }
  0xbb   : > { %v333_v3 = vadd.f32 %v332_v2, %v331_v1 }
  0xbd   : > { %v334_v4 = vrot.slane %v333_v3, 2 }
  0xbf   : > { %v335_v5 = vadd.f32 %v334_v4, %v333_v3 }
  0xc1   : > { %v336_v6 = vrot.slane %v335_v5, 1 }
  0xc3   : > { %v337_v8 = vadd.f32 %v336_v6, %v335_v5 }
  0xc5   : > { %v340_v9 = vadd.f32 %v339_v7, %v337_v8 }
  0xc7   : > { %341 = vst [vmem:[%s161_s5] sm:$0x1] %v340_v9 }
  0xc8   : > { %507 = shalt.err (!%p504_p3)
}
  0xc9   : > { %429 = dma.vmem_to_hbm [thread:$0]  (%p607_p5), %s354_s6, 16, %s356_s7, %s343_s8  }
  0xca PF: > { %p435_p4 = scmp.ge.s32.totalorder %s542_s17, 2  ;;  %s367_s20 = sand.u32 1, %s530_s14  }
  0xcb   : > { %s368_s21 = scalar_lea.sflag [#allocation4], %s367_s20 }
  0xcc   : > { %p432_p7 = pnand %p435_p4, %p611_p6 }
  0xce   : > { %p433_p8 = pneg %p432_p7 }
  0xd0   : > { %525 = dma.done.wait (%p433_p8), %s368_s21, 16  }
  0xd1   : > { %527 = vsyncadd (%p433_p8), %s368_s21, 4294967280  ;;  %p14_p9 = scmp.ge.s32.totalorder %s594_s19, 4   ;;  %s692_s14 = smov %s534_s15 }
  0xd2   : > { %s693_s15 = smov %s538_s16  ;;  %s694_s16 = smov %s605_s22 }
  0xd3   : > { %s695_s17 = smov %s594_s19  ;;  %16 = sbr.rel (!%p14_p9) target bundleno = 5 (0x5), region = 67 }
  0xd8   :  { %373 = vsyncpa [#allocation4], 1 }
  0xd9   :  { %375 = vsyncpa [#allocation4 + $0x1], 1 }

</bundles_post_ra>
